<compile_context>
chip_gen: v6e
topology: v6e:2x2x1
jax: 0.10.0
libtpu: 0.0.40
codegen_flags: <defaults>
</compile_context>

<pallas_src>
import math

import jax
import jax.numpy as jnp
from jax.experimental import pallas as pl
from jax.experimental.pallas import tpu as pltpu


def _agent_mlp_kernel(x_ref, w1_ref, b1_ref, w2_ref, b2_ref, o_ref):
    # x:  [TB, D]  f32 (cast to bf16 here)   w1: [D, H]   bf16   b1: [1, H]  f32
    # w2: [H, NP]  bf16                      b2: [1, NP]  f32    o:  [TB, NP] bf16
    x_bf = x_ref[...].astype(jnp.bfloat16)                      # VPU, hidden under MXU/DMA
    h = jnp.dot(x_bf, w1_ref[...], preferred_element_type=jnp.float32)
    h = jnp.maximum(h + b1_ref[...], 0.0)                       # bias + ReLU in f32 (VPU)
    logits = jnp.dot(h.astype(w2_ref.dtype), w2_ref[...],
                     preferred_element_type=jnp.float32)
    o_ref[...] = (logits + b2_ref[...]).astype(o_ref.dtype)     # bf16 store, f32 accum


def _round_up(n, m):
    return ((n + m - 1) // m) * m


def agent_forward(x_nchw, w1, b1, w2, b2):
    """Concrete Agent.forward: flatten NCHW -> MLP -> class logits (f32)."""
    B = x_nchw.shape[0]
    D = int(math.prod(x_nchw.shape[1:]))
    H = w1.shape[1]
    NCLS = w2.shape[1]

    # Lane-dense output: pad class dim to a multiple of 128 (weight-side only).
    NP = _round_up(max(NCLS, 128), 128)

    # Batch tiling: multiple of 16 sublanes (bf16 output packing), cap 512.
    TB = min(512, _round_up(max(B, 16), 16))
    if B >= 32:
        # Ensure >= 2 grid steps so ("parallel",) splits rows over v7x's 2 TCs.
        TB = min(TB, _round_up(pl.cdiv(B, 2), 16))
    TB = max(16, TB)
    grid = (pl.cdiv(B, TB),)   # partial final block handled by Pallas; padded
                               # rows are never written back to HBM.

    # Wrapper-side glue: flatten only (no pad, no cast of x — done in-kernel).
    x2d = x_nchw.reshape(B, D)
    w1_b = w1.astype(jnp.bfloat16)
    b1_2d = b1.reshape(1, H).astype(jnp.float32)
    w2_b = jnp.pad(w2, ((0, 0), (0, NP - NCLS))).astype(jnp.bfloat16)
    b2_2d = jnp.pad(b2.reshape(1, NCLS), ((0, 0), (0, NP - NCLS))).astype(jnp.float32)

    cost = pl.CostEstimate(
        flops=2 * B * D * H + 2 * B * H * NP,
        transcendentals=0,
        bytes_accessed=(B * D * 4          # x read (f32)
                        + D * H * 2        # W1 (bf16)
                        + H * NP * 2       # W2 (bf16)
                        + H * 4 + NP * 4   # biases (f32)
                        + B * NP * 2),     # logits writeback (bf16)
    )

    out_padded = pl.pallas_call(
        _agent_mlp_kernel,
        out_shape=jax.ShapeDtypeStruct((B, NP), jnp.bfloat16),
        grid=grid,
        in_specs=[
            # x tiled over rows (double-buffered by default); weights/biases
            # pinned to block (0,0) and single-buffered: they stay
            # VMEM-resident across the whole batch grid with no 2x allocation.
            pl.BlockSpec((TB, D), lambda i: (i, 0)),
            pl.BlockSpec((D, H), lambda i: (0, 0), pipeline_mode=pl.Buffered(1)),
            pl.BlockSpec((1, H), lambda i: (0, 0), pipeline_mode=pl.Buffered(1)),
            pl.BlockSpec((H, NP), lambda i: (0, 0), pipeline_mode=pl.Buffered(1)),
            pl.BlockSpec((1, NP), lambda i: (0, 0), pipeline_mode=pl.Buffered(1)),
        ],
        out_specs=pl.BlockSpec((TB, NP), lambda i: (i, 0)),
        compiler_params=pltpu.CompilerParams(
            dimension_semantics=("parallel",),   # v7x: shard row tiles over 2 TCs
        ),
        cost_estimate=cost,
    )(x2d, w1_b, b1_2d, w2_b, b2_2d)

    # Drop padded class columns (must happen before any argmax) and restore
    # the f32 logits contract of the PyTorch module.  Tiny [B, NCLS] op.
    return out_padded[:, :NCLS].astype(jnp.float32)


def _reference_bf16(x_nchw, w1, b1, w2, b2):
    """Same numerics as the kernel: bf16 matmul inputs, f32 accum, bf16 store."""
    x2d = x_nchw.reshape(x_nchw.shape[0], -1).astype(jnp.bfloat16)
    h = jnp.dot(x2d, w1.astype(jnp.bfloat16), preferred_element_type=jnp.float32)
    h = jnp.maximum(h + b1, 0.0)
    o = jnp.dot(h.astype(jnp.bfloat16), w2.astype(jnp.bfloat16),
                preferred_element_type=jnp.float32)
    return (o + b2).astype(jnp.bfloat16).astype(jnp.float32)


def _reference_f32(x_nchw, w1, b1, w2, b2):
    x2d = x_nchw.reshape(x_nchw.shape[0], -1)
    h = jnp.maximum(x2d @ w1 + b1, 0.0)
    return h @ w2 + b2


if __name__ == "__main__":
    # Small shapes consistent with an image-classification Agent subclass.
    B, C, HH, WW = 2, 4, 16, 16
    D = C * HH * WW          # 1024 flattened features
    HID = 128                # hidden width (lane-aligned)
    NCLS = 10                # class logits; evaluate() argmaxes over dim 1

    key = jax.random.PRNGKey(0)
    kx, kw1, kb1, kw2, kb2 = jax.random.split(key, 5)

    x = jax.random.normal(kx, (B, C, HH, WW), dtype=jnp.float32)

    # Deterministic parameter init (Kaiming-uniform-ish scaling).
    w1 = jax.random.normal(kw1, (D, HID), dtype=jnp.float32) * (1.0 / jnp.sqrt(D))
    b1 = jax.random.normal(kb1, (HID,), dtype=jnp.float32) * 0.01
    w2 = jax.random.normal(kw2, (HID, NCLS), dtype=jnp.float32) * (1.0 / jnp.sqrt(HID))
    b2 = jax.random.normal(kb2, (NCLS,), dtype=jnp.float32) * 0.01

    out = agent_forward(x, w1, b1, w2, b2)
    out = jax.block_until_ready(out)

    assert out.shape == (B, NCLS), out.shape

    # Check vs. a reference with identical bf16-in / f32-accum / bf16-out numerics.
    ref_bf16 = _reference_bf16(x, w1, b1, w2, b2)
    assert jnp.allclose(out, ref_bf16, atol=3e-2, rtol=3e-2), "mismatch vs bf16 reference"

    # Loose sanity check vs. the full-f32 PyTorch-style reference.
    ref_f32 = _reference_f32(x, w1, b1, w2, b2)
    assert jnp.allclose(out, ref_f32, atol=1e-1, rtol=1e-1), "mismatch vs f32 reference"

    # Argmax (what Agent.evaluate actually consumes) must agree.
    assert jnp.array_equal(jnp.argmax(out, axis=1), jnp.argmax(ref_f32, axis=1)), \
        "argmax mismatch vs f32 reference"

    print("KERNEL_OK")
</pallas_src>

<mosaic_0001>
module attributes {stable_mosaic.version = 11 : i64} {
  func.func @_agent_mlp_kernel(%arg0: i32, %arg1: memref<16x1024xf32, #tpu.memory_space<vmem>>, %arg2: memref<1024x128xbf16, #tpu.memory_space<vmem>>, %arg3: memref<1x128xf32, #tpu.memory_space<vmem>>, %arg4: memref<128x128xbf16, #tpu.memory_space<vmem>>, %arg5: memref<1x128xf32, #tpu.memory_space<vmem>>, %arg6: memref<16x128xbf16, #tpu.memory_space<vmem>>) attributes {dimension_semantics = [#tpu.dimension_semantics<parallel>], iteration_bounds = array<i64: 1>, scalar_prefetch = 0 : i64, scratch_operands = 0 : i64, tpu.core_type = #tpu.core_type<tc>, window_params = [{transform_indices = @transform_0, window_bounds = array<i64: 16, 1024>}, {pipeline_mode = #tpu.pipeline_mode<synchronous>, transform_indices = @transform_1, window_bounds = array<i64: 1024, 128>}, {pipeline_mode = #tpu.pipeline_mode<synchronous>, transform_indices = @transform_2, window_bounds = array<i64: 1, 128>}, {pipeline_mode = #tpu.pipeline_mode<synchronous>, transform_indices = @transform_3, window_bounds = array<i64: 128, 128>}, {pipeline_mode = #tpu.pipeline_mode<synchronous>, transform_indices = @transform_4, window_bounds = array<i64: 1, 128>}, {transform_indices = @transform_5, window_bounds = array<i64: 16, 128>}]} {
    %c0 = arith.constant 0 : index
    %c0_0 = arith.constant 0 : index
    %0 = vector.load %arg1[%c0, %c0_0] : memref<16x1024xf32, #tpu.memory_space<vmem>>, vector<16x1024xf32>
    %1 = arith.truncf %0 : vector<16x1024xf32> to vector<16x1024xbf16>
    %c0_1 = arith.constant 0 : index
    %c0_2 = arith.constant 0 : index
    %2 = vector.load %arg2[%c0_1, %c0_2] : memref<1024x128xbf16, #tpu.memory_space<vmem>>, vector<1024x128xbf16>
    %cst = arith.constant dense<0.000000e+00> : vector<16x128xf32>
    %3 = tpu.matmul %1, %2, %cst {dimension_numbers = #tpu.dot_dimension_numbers<[1], [0], [0], [1], [0, 0, 1, 1], [], []>} : vector<16x1024xbf16>, vector<1024x128xbf16>, vector<16x128xf32> -> vector<16x128xf32>
    %c0_3 = arith.constant 0 : index
    %c0_4 = arith.constant 0 : index
    %4 = vector.load %arg3[%c0_3, %c0_4] : memref<1x128xf32, #tpu.memory_space<vmem>>, vector<1x128xf32>
    %5 = vector.broadcast %4 : vector<1x128xf32> to vector<16x128xf32>
    %6 = arith.addf %3, %5 : vector<16x128xf32>
    %cst_5 = arith.constant 0.000000e+00 : f32
    %7 = vector.broadcast %cst_5 : f32 to vector<16x128xf32>
    %8 = arith.maximumf %6, %7 : vector<16x128xf32>
    %9 = arith.truncf %8 : vector<16x128xf32> to vector<16x128xbf16>
    %c0_6 = arith.constant 0 : index
    %c0_7 = arith.constant 0 : index
    %10 = vector.load %arg4[%c0_6, %c0_7] : memref<128x128xbf16, #tpu.memory_space<vmem>>, vector<128x128xbf16>
    %cst_8 = arith.constant dense<0.000000e+00> : vector<16x128xf32>
    %11 = tpu.matmul %9, %10, %cst_8 {dimension_numbers = #tpu.dot_dimension_numbers<[1], [0], [0], [1], [0, 0, 1, 1], [], []>} : vector<16x128xbf16>, vector<128x128xbf16>, vector<16x128xf32> -> vector<16x128xf32>
    %c0_9 = arith.constant 0 : index
    %c0_10 = arith.constant 0 : index
    %12 = vector.load %arg5[%c0_9, %c0_10] : memref<1x128xf32, #tpu.memory_space<vmem>>, vector<1x128xf32>
    %13 = vector.broadcast %12 : vector<1x128xf32> to vector<16x128xf32>
    %14 = arith.addf %11, %13 : vector<16x128xf32>
    %15 = arith.truncf %14 : vector<16x128xf32> to vector<16x128xbf16>
    %c0_11 = arith.constant 0 : index
    %c0_12 = arith.constant 0 : index
    %16 = vector.load %arg6[%c0_11, %c0_12] : memref<16x128xbf16, #tpu.memory_space<vmem>>, vector<16x128xbf16>
    tpu.vector_store %arg6[%c0_11, %c0_12], %15 {strides = array<i32>} : memref<16x128xbf16, #tpu.memory_space<vmem>>, vector<16x128xbf16>,
    return
  }
  func.func @transform_0(%arg0: i32) -> (i32, i32) {
    %c0_i32 = arith.constant 0 : i32
    %c0_i32_0 = arith.constant 0 : i32
    return %arg0, %c0_i32 : i32, i32
  }
  func.func @transform_1(%arg0: i32) -> (i32, i32) {
    %c0_i32 = arith.constant 0 : i32
    %c0_i32_0 = arith.constant 0 : i32
    %c0_i32_1 = arith.constant 0 : i32
    return %c0_i32, %c0_i32_0 : i32, i32
  }
  func.func @transform_2(%arg0: i32) -> (i32, i32) {
    %c0_i32 = arith.constant 0 : i32
    %c0_i32_0 = arith.constant 0 : i32
    %c0_i32_1 = arith.constant 0 : i32
    return %c0_i32, %c0_i32_0 : i32, i32
  }
  func.func @transform_3(%arg0: i32) -> (i32, i32) {
    %c0_i32 = arith.constant 0 : i32
    %c0_i32_0 = arith.constant 0 : i32
    %c0_i32_1 = arith.constant 0 : i32
    return %c0_i32, %c0_i32_0 : i32, i32
  }
  func.func @transform_4(%arg0: i32) -> (i32, i32) {
    %c0_i32 = arith.constant 0 : i32
    %c0_i32_0 = arith.constant 0 : i32
    %c0_i32_1 = arith.constant 0 : i32
    return %c0_i32, %c0_i32_0 : i32, i32
  }
  func.func @transform_5(%arg0: i32) -> (i32, i32) {
    %c0_i32 = arith.constant 0 : i32
    %c0_i32_0 = arith.constant 0 : i32
    return %arg0, %c0_i32 : i32, i32
  }
}

</mosaic_0001>

<bundles_post_ra>
// kernel: tpu_custom_call.1
= control target key start
LH: loop header
LB: loop body
LE: loop exit
PB: predicated region body
PF: predicated region fallthrough
CT: control target
= control target key end

     0   :  { %10 = vsyncpa [#allocation3], 0  ;;  %s1629_s0 = inlined_call_operand.hbm [shape: f32[2,1024], index: 0, kind: input, shape index: {}]   ;;  %s1630_s1 = inlined_call_operand.hbm [shape: bf16[1024,128], index: 1, kind: input, shape index: {}]   ;;  %s1631_s2 = inlined_call_operand.vmem [shape: f32[1,128], index: 2, kind: input, shape index: {}]   ;;  %s1632_s3 = inlined_call_operand.hbm [shape: bf16[128,128], index: 3, kind: input, shape index: {}]   ;;  %s1633_s4 = inlined_call_operand.vmem [shape: f32[1,128], index: 4, kind: input, shape index: {}]   ;;  %s1634_s5 = inlined_call_operand.hbm [shape: bf16[2,128], index: 5, kind: output, shape index: {}]  }
   0x1   :  { %11 = vsyncpa [#allocation6], 0 }
   0x2   :  { %12 = vsyncpa [#allocation4], 0 }
   0x3   :  { %17 = vsyncadd [#allocation3], 1792  ;;  %s1537_s18 = smov [#allocation5]  }
   0x4   :  { %s30_s19 = sshll.u32 %s1537_s18, 4  ;;  %s31_s19 = int_to_ptr.vmem [resolvable:$true] %s30_s19 }
   0x5   :  { %s1459_s20 = scalar_lea.vmem %s31_s19, 8192  ;;  %p1464_p1 = scmp.lt.s32.totalorder %s31_s19, %s31_s19 }
   0x6   :  { %p1460_p0 = scmp.ne.s32.totalorder %s31_s19, %s1459_s20  ;;  %p1465_p2 = scmp.lt.s32.totalorder %s1459_s20, %s1459_s20 }
   0x8   :  { %p1466_p3 = por %p1465_p2, %p1464_p1 }
   0xa   :  { %p1467_p4 = pnand %p1466_p3, %p1460_p0 }
   0xc   :  { %1470 = shalt.err (!%p1467_p4)
}
   0xd   :  { %s1538_s21 = smov 64   ;;  %s1539_s22 = smov 4  }
   0xe   :  { %36 = dma.hbm_to_vmem [thread:$0]  %s1630_s1, 8192, %s31_s19, [#allocation6], %s1538_s21, %s1538_s21, %s1539_s22  }
   0xf   :  { %s1540_s25 = smov [#allocation2]  }
  0x10   :  { %s18_s26 = sshll.u32 %s1540_s25, 4  ;;  %s19_s26 = int_to_ptr.vmem [resolvable:$true] %s18_s26 }
  0x11   :  { %s1479_s27 = scalar_lea.vmem %s19_s26, 256  ;;  %s1483_s28 = scalar_lea.vmem %s19_s26, 2048 }
  0x12   :  { %p1480_p5 = scmp.ne.s32.totalorder %s19_s26, %s1479_s27  ;;  %p1484_p6 = scmp.lt.s32.totalorder %s19_s26, %s19_s26 }
  0x13   :  { %p1485_p7 = scmp.lt.s32.totalorder %s1483_s28, %s1479_s27 }
  0x15   :  { %p1486_p8 = por %p1485_p7, %p1484_p6 }
  0x17   :  { %p1487_p9 = pnand %p1486_p8, %p1480_p5 }
  0x19   :  { %1490 = shalt.err (!%p1487_p9)
}
  0x1a   :  { %s1541_s29 = smov 256   ;;  %s1542_s30 = smov 16  }
  0x1b   :  { %24 = dma.hbm_to_vmem [thread:$0]  %s1629_s0, 256, %s19_s26, [#allocation3], %s1541_s29, %s1541_s29, %s1542_s30  }
  0x1c   :  { %s1543_s8 = smov [#allocation7]  }
  0x1d   :  { %s44_s1 = sshll.u32 %s1543_s8, 4  ;;  %s45_s1 = int_to_ptr.vmem [resolvable:$true] %s44_s1 }
  0x1e   :  { %s1499_s9 = scalar_lea.vmem %s45_s1, 1024  ;;  %p1504_p11 = scmp.lt.s32.totalorder %s45_s1, %s45_s1 }
  0x1f   :  { %p1500_p10 = scmp.ne.s32.totalorder %s45_s1, %s1499_s9  ;;  %p1505_p12 = scmp.lt.s32.totalorder %s1499_s9, %s1499_s9 }
  0x21   :  { %p1506_p13 = por %p1505_p12, %p1504_p11 }
  0x23   :  { %p1507_p0 = pnand %p1506_p13, %p1500_p10 }
  0x25   :  { %1510 = shalt.err (!%p1507_p0)
}
  0x26   :  { %50 = dma.hbm_to_vmem [thread:$0]  %s1632_s3, 1024, %s45_s1, [#allocation6], %s1538_s21, %s1538_s21, %s1539_s22  }
  0x27   :  { %1531 = dma.done.wait [#allocation3], 2048  }
  0x28   :  { %1532 = vsyncadd [#allocation3], 4294965248 }
  0x29   :  { %1533 = dma.done.wait [#allocation6], 9216  }
  0x2a   :  { %1534 = vsyncadd [#allocation6], 4294958080  ;;  %v1355_v0 = vld [vmem:[#allocation5 + $0x78] sm:$0xff]   ;;  %v1359_v4 = vld [vmem:[#allocation5 + $0x70] sm:$0xff]   ;;  %v1544_v25 = vmov 1983009808   ;;  %v102_v27 = vlaneseq }
  0x2b   :  { %v1356_v1 = vld [vmem:[#allocation5 + $0xf8] sm:$0xff]   ;;  %1225 = vmatprep.subr.bf16.mxu0 %v1355_v0  ;;  %v1360_v5 = vld [vmem:[#allocation5 + $0xf0] sm:$0xff]   ;;  %v1363_v8 = vld [vmem:[#allocation5 + $0x68] sm:$0xff]   ;;  %v100_v26 = vunpack.c.l.s4 %v1544_v25  ;;  %vm1546_vm0 = vmmov 0  }
  0x2c   :  { %v1357_v2 = vld [vmem:[#allocation5 + $0x38] sm:$0xff]   ;;  %1247 = vmatprep.subr.bf16.mxu1 %v1356_v1  ;;  %v1361_v6 = vld [vmem:[#allocation5 + $0x30] sm:$0xff]   ;;  %v1364_v9 = vld [vmem:[#allocation5 + $0xe8] sm:$0xff]   ;;  %v1596_v33 = vshrl.u32 %v102_v27, 7 }
  0x2d   :  { %v1358_v3 = vld [vmem:[#allocation5 + $0xb8] sm:$0xff]   ;;  %1226 = vmatpush3.bf16.msra.mxu0 %v1357_v2  ;;  %v1362_v7 = vld [vmem:[#allocation5 + $0xb0] sm:$0xff]   ;;  %v1365_v10 = vld [vmem:[#allocation5 + $0x28] sm:$0xff]   ;;  %v101_v32 = vunpack.c.0.s8 %v100_v26 }
  0x2e   :  { %1248 = vmatpush3.bf16.msra.mxu1 %v1358_v3  ;;  %1227 = vmatprep.subr.bf16.mxu0 %v1359_v4  ;;  %v1366_v11 = vld [vmem:[#allocation5 + $0xa8] sm:$0xff]   ;;  %v1367_v12 = vld [vmem:[#allocation5 + $0x60] sm:$0xff]   ;;  %v1371_v16 = vld [vmem:[#allocation5 + $0x58] sm:$0xff]  }
  0x2f   :  { %1249 = vmatprep.subr.bf16.mxu1 %v1360_v5  ;;  %v1368_v13 = vld [vmem:[#allocation5 + $0xe0] sm:$0xff]   ;;  %v1372_v17 = vld [vmem:[#allocation5 + $0xd8] sm:$0xff]   ;;  %v1375_v20 = vld [vmem:[#allocation5 + $0x50] sm:$0xff]   ;;  %v1599_v37 = vsub.s32 %v101_v32, %v1596_v33 }
  0x30   :  { %v1369_v14 = vld [vmem:[#allocation5 + $0x20] sm:$0xff]   ;;  %v1373_v18 = vld [vmem:[#allocation5 + $0x18] sm:$0xff]   ;;  %v1376_v21 = vld [vmem:[#allocation5 + $0xd0] sm:$0xff]  }
  0x31   :  { %1228 = vmatpush3.bf16.msra.mxu0 %v1361_v6  ;;  %v1370_v15 = vld [vmem:[#allocation5 + $0xa0] sm:$0xff]   ;;  %v1374_v19 = vld [vmem:[#allocation5 + $0x98] sm:$0xff]   ;;  %v1377_v22 = vld [vmem:[#allocation5 + $0x10] sm:$0xff]  }
  0x32   :  { %1250 = vmatpush3.bf16.msra.mxu1 %v1362_v7  ;;  %1229 = vmatprep.subr.bf16.mxu0 %v1363_v8  ;;  %v1378_v23 = vld [vmem:[#allocation5 + $0x90] sm:$0xff]   ;;  %v1379_v24 = vld [vmem:[#allocation5 + $0x48] sm:$0xff]   ;;  %v1383_v31 = vld [vmem:[#allocation5 + $0x40] sm:$0xff]  }
  0x33   :  { %1251 = vmatprep.subr.bf16.mxu1 %v1364_v9  ;;  %v1380_v28 = vld [vmem:[#allocation5 + $0xc8] sm:$0xff]   ;;  %v1384_v34 = vld [vmem:[#allocation5 + $0xc0] sm:$0xff]   ;;  %v1399_v53 = vld [vmem:[#allocation5 + $0x178] sm:$0xff]  }
  0x34   :  { %v1381_v29 = vld [vmem:[#allocation5 + $0x8] sm:$0xff]   ;;  %v1385_v35 = vld [vmem:[#allocation5] sm:$0xff]   ;;  %v1400_v58 = vld [vmem:[#allocation5 + $0x1f8] sm:$0xff]  }
  0x35   :  { %1230 = vmatpush3.bf16.msra.mxu0 %v1365_v10  ;;  %v1382_v30 = vld [vmem:[#allocation5 + $0x88] sm:$0xff]   ;;  %v1386_v36 = vld [vmem:[#allocation5 + $0x80] sm:$0xff]   ;;  %v1401_v62 = vld [vmem:[#allocation5 + $0x138] sm:$0xff]  }
  0x36   :  { %1252 = vmatpush3.bf16.msra.mxu1 %v1366_v11  ;;  %1231 = vmatprep.subr.bf16.mxu0 %v1367_v12  ;;  %v1387_v38 = vld [vmem:[#allocation2] ss:$16 sps:$4 sm:$0xff]   ;;  %v1395_v43 = vld [vmem:[#allocation2 + $0x4] ss:$16 sps:$4 sm:$0xff]   ;;  %v1402_v2 = vld [vmem:[#allocation5 + $0x1b8] sm:$0xff]  }
  0x37   :  { %1253 = vmatprep.subr.bf16.mxu1 %v1368_v13  ;;  %v1389_v39 = vld [vmem:[#allocation2 + $0x20] ss:$16 sps:$4 sm:$0xff]   ;;  %v105_v42 = vrot.slane %v1387_v38, %v1599_v37  ;;  %v1396_v44 = vld [vmem:[#allocation2 + $0x24] ss:$16 sps:$4 sm:$0xff]   ;;  %v112_v50 = vrot.slane %v1395_v43, %v1599_v37  ;;  %v1407_v10 = vld [vmem:[#allocation5 + $0x168] sm:$0xff]  }
  0x38   :  { %v1391_v40 = vld [vmem:[#allocation2 + $0x40] ss:$16 sps:$4 sm:$0xff]   ;;  %v1397_v45 = vld [vmem:[#allocation2 + $0x44] ss:$16 sps:$4 sm:$0xff]   ;;  %v119_v46 = vrot.slane %v1389_v39, %v1599_v37  ;;  %v126_v51 = vrot.slane %v1396_v44, %v1599_v37  ;;  %v1408_v11 = vld [vmem:[#allocation5 + $0x1e8] sm:$0xff]  }
  0x39   :  { %1232 = vmatpush3.bf16.msra.mxu0 %v1369_v14  ;;  %v1393_v41 = vld [vmem:[#allocation2 + $0x60] ss:$16 sps:$4 sm:$0xff]   ;;  %v177_v47 = vrot.slane %v1391_v40, %v1599_v37  ;;  %v1398_v49 = vld [vmem:[#allocation2 + $0x64] ss:$16 sps:$4 sm:$0xff]   ;;  %v184_v52 = vrot.slane %v1397_v45, %v1599_v37  ;;  %v1409_v12 = vld [vmem:[#allocation5 + $0x128] sm:$0xff]  }
  0x3a   :  { %1254 = vmatpush3.bf16.msra.mxu1 %v1370_v15  ;;  %1233 = vmatprep.subr.bf16.mxu0 %v1371_v16  ;;  %v191_v48 = vrot.slane %v1393_v41, %v1599_v37  ;;  %v128_v54 = vcombine.high %v105_v42, %v119_v46  ;;  %v198_v56 = vrot.slane %v1398_v49, %v1599_v37  ;;  %v1403_v4 = vld [vmem:[#allocation5 + $0x170] sm:$0xff]   ;;  %v1410_v13 = vld [vmem:[#allocation5 + $0x1a8] sm:$0xff]   ;;  %v1411_v14 = vld [vmem:[#allocation5 + $0x160] sm:$0xff]  }
  0x3b   :  { %1255 = vmatprep.subr.bf16.mxu1 %v1372_v17  ;;  %v127_v57 = vcombine.low %v105_v42, %v119_v46  ;;  %v130_v59 = vcombine.high %v112_v50, %v126_v51  ;;  %v129_v61 = vcombine.low %v112_v50, %v126_v51  ;;  %v1404_v7 = vld [vmem:[#allocation5 + $0x1f0] sm:$0xff]   ;;  %v1412_v15 = vld [vmem:[#allocation5 + $0x1e0] sm:$0xff]   ;;  %v1423_v26 = vld [vmem:[#allocation5 + $0x148] sm:$0xff]  }
  0x3c   :  { %v200_v55 = vcombine.high %v177_v47, %v191_v48  ;;  %v199_v60 = vcombine.low %v177_v47, %v191_v48  ;;  %v202_v0 = vcombine.high %v184_v52, %v198_v56  ;;  %v201_v1 = vcombine.low %v184_v52, %v198_v56  ;;  %v1405_v8 = vld [vmem:[#allocation5 + $0x130] sm:$0xff]   ;;  %v1413_v16 = vld [vmem:[#allocation5 + $0x120] sm:$0xff]   ;;  %v1424_v27 = vld [vmem:[#allocation5 + $0x1c8] sm:$0xff]  }
  0x3d   :  { %1234 = vmatpush3.bf16.msra.mxu0 %v1373_v18  ;;  %v1406_v9 = vld [vmem:[#allocation5 + $0x1b0] sm:$0xff]   ;;  %v1414_v17 = vld [vmem:[#allocation5 + $0x1a0] sm:$0xff]   ;;  %v1415_v18 = vld [vmem:[#allocation5 + $0x158] sm:$0xff]  }
  0x3e   :  { %1256 = vmatpush3.bf16.msra.mxu1 %v1374_v19  ;;  %1235 = vmatprep.subr.bf16.mxu0 %v1375_v20  ;;  %v256_v63 = vpack.c.bf16 %v200_v55, %v128_v54  ;;  %v255_v3 = vpack.c.bf16 %v199_v60, %v127_v57  ;;  %v258_v5 = vpack.c.bf16 %v202_v0, %v130_v59  ;;  %v1416_v19 = vld [vmem:[#allocation5 + $0x1d8] sm:$0xff]   ;;  %v1422_v25 = vld [vmem:[#allocation5 + $0x190] sm:$0xff]   ;;  %v1429_v32 = vld [vmem:[#allocation5 + $0x100] sm:$0xff]  }
  0x3f   :  { %1257 = vmatprep.subr.bf16.mxu1 %v1376_v21  ;;  %v257_v6 = vpack.c.bf16 %v201_v1, %v129_v61  ;;  %v1417_v20 = vld [vmem:[#allocation5 + $0x118] sm:$0xff]   ;;  %v1545_v1 = vmov 0.0  }
  0x40   :  { %814 = vmatprep.mubr.bf16.mxu0 %v256_v63  ;;  %855 = vmatprep.mubr.bf16.mxu1 %v258_v5  ;;  %v1418_v21 = vld [vmem:[#allocation5 + $0x198] sm:$0xff]   ;;  %v1448_v5 = vld [vmem:[#allocation7 + $0x10] sm:$0xff]  }
  0x41   :  { %1236 = vmatpush3.bf16.msra.mxu0 %v1377_v22  ;;  %v1419_v22 = vld [vmem:[#allocation5 + $0x150] sm:$0xff]   ;;  %v1435_v38 = vld [vmem:[#allocation2 + $0x48] ss:$16 sps:$4 sm:$0xff]   ;;  %v1439_v40 = vld [vmem:[#allocation2 + $0xc] ss:$16 sps:$4 sm:$0xff]  }
  0x42   :  { %1258 = vmatpush3.bf16.msra.mxu1 %v1378_v23  ;;  %1237 = vmatprep.subr.bf16.mxu0 %v1379_v24  ;;  %v1420_v23 = vld [vmem:[#allocation5 + $0x1d0] sm:$0xff]   ;;  %v1437_v39 = vld [vmem:[#allocation2 + $0x68] ss:$16 sps:$4 sm:$0xff]   ;;  %v1440_v41 = vld [vmem:[#allocation2 + $0x2c] ss:$16 sps:$4 sm:$0xff]   ;;  %v213_v44 = vrot.slane %v1435_v38, %v1599_v37  ;;  %v148_v48 = vrot.slane %v1439_v40, %v1599_v37 }
  0x43   :  { %1259 = vmatprep.subr.bf16.mxu1 %v1380_v28  ;;  %v1421_v24 = vld [vmem:[#allocation5 + $0x110] sm:$0xff]   ;;  %v1425_v28 = vld [vmem:[#allocation5 + $0x108] sm:$0xff]   ;;  %v227_v47 = vrot.slane %v1437_v39, %v1599_v37  ;;  %v162_v49 = vrot.slane %v1440_v41, %v1599_v37  ;;  %v1443_v0 = vld [vmem:[#allocation7 + $0x38] sm:$0xff]  }
  0x44   :  { %v1441_v45 = vld [vmem:[#allocation2 + $0x4c] ss:$16 sps:$4 sm:$0xff]  }
  0x45   :  { %1238 = vmatpush3.bf16.msra.mxu0 %v1381_v29  ;;  %v1426_v29 = vld [vmem:[#allocation5 + $0x188] sm:$0xff]   ;;  %v220_v51 = vrot.slane %v1441_v45, %v1599_v37  ;;  %v236_v54 = vcombine.high %v213_v44, %v227_v47  ;;  %v166_v55 = vcombine.high %v148_v48, %v162_v49  ;;  %v235_v56 = vcombine.low %v213_v44, %v227_v47 }
  0x46   :  { %1260 = vmatpush3.bf16.msra.mxu1 %v1382_v30  ;;  %1239 = vmatprep.subr.bf16.mxu0 %v1383_v31  ;;  %v1427_v30 = vld [vmem:[#allocation5 + $0x140] sm:$0xff]   ;;  %v1442_v46 = vld [vmem:[#allocation2 + $0x6c] ss:$16 sps:$4 sm:$0xff]   ;;  %v165_v57 = vcombine.low %v148_v48, %v162_v49 }
  0x47   :  { %1261 = vmatprep.subr.bf16.mxu1 %v1384_v34  ;;  %v1428_v31 = vld [vmem:[#allocation5 + $0x1c0] sm:$0xff]   ;;  %v234_v52 = vrot.slane %v1442_v46, %v1599_v37  ;;  %v1547_v46 = vmov 1966171168  }
  0x48   :  { %v1430_v34 = vld [vmem:[#allocation5 + $0x180] sm:$0xff]   ;;  %v1065_v47 = vunpack.c.l.s4 %v1547_v46 }
  0x49   :  { %1240 = vmatpush3.bf16.msra.mxu0 %v1385_v35  ;;  %v1431_v35 = vld [vmem:[#allocation2 + $0x8] ss:$16 sps:$4 sm:$0xff]   ;;  %v237_v59 = vcombine.low %v220_v51, %v234_v52 }
  0x4a   :  { %1262 = vmatpush3.bf16.msra.mxu1 %v1386_v36  ;;  %1269 = vmatprep.subr.bf16.mxu0 %v1399_v53  ;;  %v1433_v36 = vld [vmem:[#allocation2 + $0x28] ss:$16 sps:$4 sm:$0xff]   ;;  %v141_v42 = vrot.slane %v1431_v35, %v1599_v37  ;;  %v1066_v49 = vunpack.c.0.s8 %v1065_v47 }
  0x4b   :  { %1291 = vmatprep.subr.bf16.mxu1 %v1400_v58  ;;  %v155_v43 = vrot.slane %v1433_v36, %v1599_v37  ;;  %v238_v58 = vcombine.high %v220_v51, %v234_v52  ;;  %v261_v63 = vpack.c.bf16 %v237_v59, %v165_v57  ;;  %v1444_v37 = vld [vmem:[#allocation7 + $0x30] sm:$0xff]  }
  0x4c   :  { %815 = vmatmul.mubr.bf16.vlgmr.msra.gmra.mxu0 %v255_v3  ;;  %v1446_v3 = vld [vmem:[#allocation7 + $0x20] sm:$0xff]  }
  0x4d   :  { %1270 = vmatpush3.bf16.msra.mxu0 %v1401_v62  ;;  %856 = vmatmul.mubr.bf16.vlgmr.msra.gmra.mxu1 %v257_v6  ;;  %v164_v50 = vcombine.high %v141_v42, %v155_v43  ;;  %v163_v53 = vcombine.low %v141_v42, %v155_v43  ;;  %v262_v62 = vpack.c.bf16 %v238_v58, %v166_v55  ;;  %v1449_v6 = vld [vmem:[#allocation7 + $0x8] sm:$0xff]  }
  0x4e   :  { %1271 = vmatprep.subr.bf16.mxu0 %v1403_v4  ;;  %1292 = vmatpush3.bf16.msra.mxu1 %v1402_v2  ;;  %v1445_v2 = vld [vmem:[#allocation7 + $0x28] sm:$0xff]   ;;  %v1447_v4 = vld [vmem:[#allocation7 + $0x18] sm:$0xff]   ;;  %v1069_v55 = vsub.s32 %v1066_v49, %v1596_v33 }
  0x4f   :  { %1293 = vmatprep.subr.bf16.mxu1 %v1404_v7  ;;  %v260_v60 = vpack.c.bf16 %v236_v54, %v164_v50  ;;  %v259_v61 = vpack.c.bf16 %v235_v56, %v163_v53  ;;  %937 = vmatprep.mubr.bf16.mxu1 %v262_v62  ;;  %v1450_v7 = vld [vmem:[#allocation7] sm:$0xff]  }
  0x50   :  { %v1211_v50 = vld [vmem:[%s1633_s4] ss:$0 sm:$0xff] }
  0x51   :  { %1272 = vmatpush3.bf16.msra.mxu0 %v1405_v8  ;;  %896 = vmatprep.mubr.bf16.mxu0 %v260_v60 }
  0x52   :  { %1273 = vmatprep.subr.bf16.mxu0 %v1407_v10  ;;  %1294 = vmatpush3.bf16.msra.mxu1 %v1406_v9 }
  0x53   :  { %1295 = vmatprep.subr.bf16.mxu1 %v1408_v11 }
  0x55   :  { %1274 = vmatpush3.bf16.msra.mxu0 %v1409_v12 }
  0x56   :  { %1275 = vmatprep.subr.bf16.mxu0 %v1411_v14  ;;  %1296 = vmatpush3.bf16.msra.mxu1 %v1410_v13 }
  0x57   :  { %1297 = vmatprep.subr.bf16.mxu1 %v1412_v15  ;;  %v1146_v15 = vld [vmem:[%s1631_s2] ss:$0 sm:$0xff] }
  0x59   :  { %1276 = vmatpush3.bf16.msra.mxu0 %v1413_v16 }
  0x5a   :  { %1277 = vmatprep.subr.bf16.mxu0 %v1415_v18  ;;  %1298 = vmatpush3.bf16.msra.mxu1 %v1414_v17 }
  0x5b   :  { %1299 = vmatprep.subr.bf16.mxu1 %v1416_v19 }
  0x5d   :  { %1278 = vmatpush3.bf16.msra.mxu0 %v1417_v20 }
  0x5e   :  { %1279 = vmatprep.subr.bf16.mxu0 %v1419_v22  ;;  %1300 = vmatpush3.bf16.msra.mxu1 %v1418_v21 }
  0x5f   :  { %1301 = vmatprep.subr.bf16.mxu1 %v1420_v23 }
  0x61   :  { %1280 = vmatpush3.bf16.msra.mxu0 %v1421_v24 }
  0x62   :  { %1281 = vmatprep.subr.bf16.mxu0 %v1423_v26  ;;  %1302 = vmatpush3.bf16.msra.mxu1 %v1422_v25 }
  0x63   :  { %1303 = vmatprep.subr.bf16.mxu1 %v1424_v27 }
  0x65   :  { %1282 = vmatpush3.bf16.msra.mxu0 %v1425_v28 }
  0x66   :  { %1283 = vmatprep.subr.bf16.mxu0 %v1427_v30  ;;  %1304 = vmatpush3.bf16.msra.mxu1 %v1426_v29 }
  0x67   :  { %1305 = vmatprep.subr.bf16.mxu1 %v1428_v31 }
  0x69   :  { %1284 = vmatpush3.bf16.msra.mxu0 %v1429_v32 }
  0x6a   :  { %1306 = vmatpush3.bf16.msra.mxu1 %v1430_v34  ;;  %1322 = vmatprep.subr.bf16.mxu0 %v1545_v1 }
  0x6c   :  { %897 = vmatmul.mubr.bf16.vlgmr.msra.gmra.mxu0 %v259_v61 }
  0x6d   :  { %938 = vmatmul.mubr.bf16.vlgmr.msra.gmra.mxu1 %v261_v63  ;;  %1323 = vmatpush3.bf16.msra.mxu0 %v1443_v0 }
  0x6e   :  { %1324 = vmatprep.subr.bf16.mxu0 %v1545_v1  ;;  %1338 = vmatprep.mubr.msk.bf16.mxu0 %vm1546_vm0, %v1545_v1 }
  0x71   :  { %1325 = vmatpush3.bf16.msra.mxu0 %v1444_v37 }
  0x72   :  { %1326 = vmatprep.subr.bf16.mxu0 %v1545_v1 }
  0x75   :  { %1327 = vmatpush3.bf16.msra.mxu0 %v1445_v2 }
  0x76   :  { %1328 = vmatprep.subr.bf16.mxu0 %v1545_v1 }
  0x79   :  { %1329 = vmatpush3.bf16.msra.mxu0 %v1446_v3 }
  0x7a   :  { %1330 = vmatprep.subr.bf16.mxu0 %v1545_v1 }
  0x7d   :  { %1331 = vmatpush3.bf16.msra.mxu0 %v1447_v4 }
  0x7e   :  { %1332 = vmatprep.subr.bf16.mxu0 %v1545_v1 }
  0x81   :  { %1333 = vmatpush3.bf16.msra.mxu0 %v1448_v5 }
  0x82   :  { %1334 = vmatprep.subr.bf16.mxu0 %v1545_v1 }
  0x85   :  { %1335 = vmatpush3.bf16.msra.mxu0 %v1449_v6 }
  0x86   :  { %1336 = vmatprep.subr.bf16.mxu0 %v1545_v1 }
  0x89   :  { %1337 = vmatpush3.bf16.msra.mxu0 %v1450_v7 }
 0x10c   :  { %v1241_v8 = vpop.f32.mrf.mxu0 }
 0x10d   :  { %v1263_v9 = vpop.f32.mrf.mxu1 }
 0x10e   :  { %v1242_v10 = vpop.f32.mrf.mxu0 }
 0x10f   :  { %v1264_v11 = vpop.f32.mrf.mxu1  ;;  %v1243_v13 = vadd.f32 %v1242_v10, %v1241_v8 }
 0x110   :  { %v1244_v12 = vpop.f32.mrf.mxu0  ;;  %v1265_v18 = vadd.f32 %v1264_v11, %v1263_v9 }
 0x111   :  { %v1266_v14 = vpop.f32.mrf.mxu1  ;;  %v817_v17 = vadd.f32 %v1243_v13, %v1146_v15 }
 0x112   :  { %v1245_v16 = vpop.f32.mrf.mxu0 }
 0x113   :  { %v1246_v19 = vadd.f32 %v1245_v16, %v1244_v12  ;;  %v1267_v20 = vpop.f32.mrf.mxu1  ;;  %v858_v24 = vadd.f32 %v1265_v18, %v817_v17 }
 0x114   :  { %v1268_v29 = vadd.f32 %v1267_v20, %v1266_v14 }
 0x115   :  { %v820_v25 = vadd.f32 %v1246_v19, %v1146_v15 }
 0x117   :  { %v861_v34 = vadd.f32 %v1268_v29, %v820_v25 }
 0x12c   :  { %v1285_v21 = vpop.f32.mrf.mxu0 }
 0x12d   :  { %v1307_v22 = vpop.f32.mrf.mxu1 }
 0x12e   :  { %v1286_v23 = vpop.f32.mrf.mxu0 }
 0x12f   :  { %v1287_v26 = vadd.f32 %v1286_v23, %v1285_v21  ;;  %v1308_v27 = vpop.f32.mrf.mxu1 }
 0x130   :  { %v1288_v28 = vpop.f32.mrf.mxu0  ;;  %v1309_v35 = vadd.f32 %v1308_v27, %v1307_v22 }
 0x131   :  { %v899_v30 = vadd.f32 %v1287_v26, %v858_v24  ;;  %v1310_v31 = vpop.f32.mrf.mxu1 }
 0x132   :  { %v1289_v32 = vpop.f32.mrf.mxu0 }
 0x133   :  { %v1290_v36 = vadd.f32 %v1289_v32, %v1288_v28  ;;  %v1311_v38 = vpop.f32.mrf.mxu1  ;;  %v940_v39 = vadd.f32 %v1309_v35, %v899_v30 }
 0x134   :  { %v1312_v41 = vadd.f32 %v1311_v38, %v1310_v31 }
 0x135   :  { %v902_v40 = vadd.f32 %v1290_v36, %v861_v34  ;;  %v946_v43 = vmax.f32 %v940_v39, 0.0 }
 0x137   :  { %v943_v42 = vadd.f32 %v1312_v41, %v902_v40 }
 0x139   :  { %v947_v44 = vmax.f32 %v943_v42, 0.0 }
 0x13b   :  { %v948_v45 = vpack.c.bf16 %v947_v44, %v946_v43 }
 0x13d   :  { %1339 = vmatmul.mubr.bf16.vlgmr.msra.gmra.mxu0 %v948_v45 }
 0x1fd   :  { %v1054_v48 = vpop.f32.mrf.mxu0 }
 0x1fe   :  { %v1055_v53 = vadd.f32 %v1211_v50, %v1054_v48 }
 0x1ff   :  { %v1340_v51 = vpop.f32.mrf.mxu0 }
 0x201   :  { %v1057_v52 = vpop.f32.mrf.mxu0 }
 0x202   :  { %v1058_v54 = vadd.f32 %v1211_v50, %v1057_v52 }
 0x203   :  { %v1341_v56 = vpop.f32.mrf.mxu0 }
 0x204   :  { %v1061_v57 = vpack.c.bf16 %v1058_v54, %v1055_v53  ;;  %v1220_v58 = vpack.c.bf16 %v1058_v54, %v1058_v54 }
 0x206   :  { %v1070_v59 = vrot.slane %v1061_v57, %v1069_v55  ;;  %v1077_v60 = vrot.slane %v1220_v58, %v1069_v55 }
 0x208   :  { %v1078_v61 = vcombine.high %v1070_v59, %v1070_v59  ;;  %v1079_v62 = vcombine.high %v1077_v60, %v1077_v60  ;;  %v1086_v63 = vrot.slane %v1070_v59, %v1069_v55  ;;  %v1093_v0 = vrot.slane %v1077_v60, %v1069_v55  ;;  %1221 = vst.sshfl [vmem:[#allocation8] sm:$0x1 pattern:$0x73625140] %v1070_v59 }
 0x209   :  { %1223 = vst.sshfl [vmem:[#allocation8 + $0x4] sm:$0x1 pattern:$0x73625140] %v1077_v60 }
 0x20a   :  { %v1100_v1 = vrot.slane %v1078_v61, %v1069_v55  ;;  %v1107_v37 = vrot.slane %v1079_v62, %v1069_v55  ;;  %v1108_v2 = vcombine.high %v1086_v63, %v1086_v63  ;;  %v1109_v3 = vcombine.high %v1093_v0, %v1093_v0  ;;  %1222 = vst.sshfl [vmem:[#allocation8 + $0x1] sm:$0x1 pattern:$0x73625140] %v1078_v61 }
 0x20b   :  { %1224 = vst.sshfl [vmem:[#allocation8 + $0x5] sm:$0x1 pattern:$0x73625140] %v1079_v62 }
 0x20c   :  { %v1110_v4 = vcombine.high %v1100_v1, %v1100_v1  ;;  %v1111_v5 = vcombine.high %v1107_v37, %v1107_v37  ;;  %1122 = vst [vmem:[#allocation8 + $0x2] sm:$0x1] %v1108_v2  ;;  %1126 = vst [vmem:[#allocation8 + $0x6] sm:$0x1] %v1109_v3 }
 0x20e   :  { %1123 = vst [vmem:[#allocation8 + $0x3] sm:$0x1] %v1110_v4  ;;  %1127 = vst [vmem:[#allocation8 + $0x7] sm:$0x1] %v1111_v5 }
 0x20f   :  { %1132 = vsyncadd [#allocation4], 112  ;;  %s1548_s4 = smov [#allocation8]  }
 0x210   :  { %s1133_s13 = sshll.u32 %s1548_s4, 4  ;;  %s1134_s13 = int_to_ptr.vmem [resolvable:$true] %s1133_s13 }
 0x211   :  { %s1511_s14 = scalar_lea.vmem %s1134_s13, 16  ;;  %s1515_s15 = scalar_lea.vmem %s1134_s13, 128 }
 0x212   :  { %p1512_p1 = scmp.ne.s32.totalorder %s1134_s13, %s1511_s14  ;;  %p1516_p2 = scmp.lt.s32.totalorder %s1134_s13, %s1134_s13 }
 0x213   :  { %p1517_p3 = scmp.lt.s32.totalorder %s1515_s15, %s1511_s14 }
 0x215   :  { %p1518_p4 = por %p1517_p3, %p1516_p2 }
 0x217   :  { %p1519_p5 = pnand %p1518_p4, %p1512_p1 }
 0x219   :  { %1522 = shalt.err (!%p1519_p5)
}
 0x21a   :  { %s1549_s16 = smov 1  }
 0x21b   :  { %1139 = dma.vmem_to_hbm [thread:$0]  %s1134_s13, 16, %s1634_s5, [#allocation4], %s1542_s30, %s1542_s30, %s1549_s16  }
 0x21c   :  { %1535 = dma.done.wait [#allocation4], 128  }
 0x21d   :  { %1536 = vsyncadd [#allocation4], 4294967168 }
 0x21e   :  { %1143 = vsyncpa [#allocation3], 1 }
 0x21f   :  { %1144 = vsyncpa [#allocation6], 1 }
 0x220   :  { %1145 = vsyncpa [#allocation4], 1 }

</bundles_post_ra>
